<compile_context>
chip_gen: v5e
topology: v5e:2x2
jax: 0.10.0
libtpu: 0.0.40
codegen_flags: <defaults>
</compile_context>

<pallas_src>
import jax
import jax.numpy as jnp
import numpy as np
from jax.experimental import pallas as pl
from jax.experimental.pallas import tpu as pltpu

EPS = 1e-8  # gLN epsilon (asteroid / CTCNet convention)


# ----------------------------------------------------------------------------
# Kernel
# ----------------------------------------------------------------------------
def _conv_gln(x_main, x_cross, w_main_ref, w_cross_ref, b_ref, g_ref, beta_ref,
              o_ref):
    """1x1 Conv1d over [x_main ; x_cross] (split matmul) + bias + gLN.

    x_main/x_cross: bf16 (C*, T) tiles. MXU accumulation in f32. The conv bias
    is folded into the gLN statistics analytically (it never touches the big
    tile), and the normalization+affine collapses to per-channel scale/shift.
    """
    # y = W[:, :C0] @ x_main + W[:, C0:] @ x_cross   (bias handled analytically)
    y = (jnp.dot(w_main_ref[...], x_main, preferred_element_type=jnp.float32)
         + jnp.dot(w_cross_ref[...], x_cross, preferred_element_type=jnp.float32))

    cout, t = y.shape
    inv_n = 1.0 / float(cout * t)
    b = b_ref[...]                                   # (Cout, 1) f32
    g = g_ref[...]
    beta = beta_ref[...]

    # single-pass f32 stats of (y + b):
    #   sum(y+b)   = sum(y) + T*sum(b)
    #   sum((y+b)^2) = sum(y^2) + 2*sum_c b_c*rowsum_c(y) + T*sum(b^2)
    rowsum = jnp.sum(y, axis=1, keepdims=True)       # (Cout, 1)
    s1 = jnp.sum(rowsum) + float(t) * jnp.sum(b)
    s2 = (jnp.sum(y * y) + 2.0 * jnp.sum(b * rowsum) + float(t) * jnp.sum(b * b))
    mean = s1 * inv_n
    var = jnp.maximum(s2 * inv_n - mean * mean, 0.0)
    inv_std = jax.lax.rsqrt(var + EPS)               # EUP slot

    scale = g * inv_std                              # (Cout, 1)
    shift = beta + (b - mean) * scale                # (Cout, 1)
    o_ref[0] = (y * scale + shift).astype(o_ref.dtype)


def _fusion_kernel(a_ref, v_ref, eup_ref, ddn_ref,
                   waa_ref, wav_ref, ba_ref, ga_ref, bta_ref,
                   wva_ref, wvv_ref, bv_ref, gv_ref, btv_ref,
                   ao_ref, vo_ref):
    """One batch element per grid step; channels-first (C, T) layout."""
    a_bf = a_ref[0].astype(jnp.bfloat16)             # (Ca, Ta)
    v_bf = v_ref[0].astype(jnp.bfloat16)             # (Cv, Tv)

    # Nearest-neighbour resize as a one-hot selection matmul: the resized
    # tensors never round-trip through HBM, no lane-axis gather needs to
    # lower, and the MXU is idle in this memory-bound regime anyway.
    sv_bf = jnp.dot(v_bf, eup_ref[...],
                    preferred_element_type=jnp.float32).astype(jnp.bfloat16)  # (Cv, Ta)
    sa_bf = jnp.dot(a_bf, ddn_ref[...],
                    preferred_element_type=jnp.float32).astype(jnp.bfloat16)  # (Ca, Tv)

    # audio stream: Conv1d(k=1)([a ; resize(v -> Ta)]) -> gLN
    _conv_gln(a_bf, sv_bf, waa_ref, wav_ref, ba_ref, ga_ref, bta_ref, ao_ref)
    # video stream: Conv1d(k=1)([resize(a -> Tv) ; v]) -> gLN
    _conv_gln(sa_bf, v_bf, wva_ref, wvv_ref, bv_ref, gv_ref, btv_ref, vo_ref)


# ----------------------------------------------------------------------------
# Host-side helpers
# ----------------------------------------------------------------------------
def _nearest_index(out_size, in_size):
    """PyTorch F.interpolate(mode='nearest') source indices."""
    return (np.arange(out_size) * in_size) // out_size


def _selection_matrix(in_size, out_size):
    """S (in_size, out_size), S[j, t] = 1 iff nearest(t) == j, so that
    x @ S == F.interpolate(x, size=out_size, mode='nearest') on the last axis.
    0/1 values are exact in bf16."""
    idx = _nearest_index(out_size, in_size)                      # (out_size,)
    onehot = (np.arange(in_size)[:, None] == idx[None, :])       # (in, out)
    return jnp.asarray(onehot.astype(np.float32), dtype=jnp.bfloat16)


def _vmem_limit_bytes(Ca, Cv, Ta, Tv, in_bytes, out_bytes):
    # pipeline-managed, double-buffered per-batch blocks
    blocks = 2 * ((Ca * Ta + Cv * Tv) * in_bytes
                  + (Ca * Ta + Cv * Tv) * out_bytes)
    # resident (constant index-map) operands: resize matrices, weights, affine
    resident = 2 * (Ta * Tv) * 2
    resident += (Ca + Cv) * (Ca + Cv) * 2 + 6 * (Ca + Cv) * 4
    # in-kernel temporaries: f32 accumulators (+ y*y), bf16 casts & resizes
    temps = 2 * (Ca * Ta + Cv * Tv) * 4
    temps += (Ca * Ta + Cv * Tv + Cv * Ta + Ca * Tv) * 2
    need = int((blocks + resident + temps) * 1.5) + (4 << 20)   # Mosaic headroom
    try:
        cap = int(pltpu.get_tpu_info().vmem_capacity_bytes * 0.85)
    except Exception:
        cap = 48 << 20   # safe on every generation incl. v7x (64 MiB physical)
    # TODO(synk): if `need` > `cap` (very long Ta on v7x) switch to the
    # T-tiled two-pass gLN instead of clamping.
    return min(max(need, 32 << 20), cap)


def concat_fc2(a, v, params, out_dtype=jnp.bfloat16):
    """ConcatFC2 forward.  a: (B, Ca, Ta), v: (B, Cv, Tv)
    -> (a_out (B, Ca, Ta), v_out (B, Cv, Tv)) in `out_dtype`.

    Default output dtype is bf16 (what the downstream fusion blocks consume);
    pass jnp.float32 if the PyTorch f32 output is needed bit-for-bit-ish.
    """
    B, Ca, Ta = a.shape
    _, Cv, Tv = v.shape

    # nearest-resize selection matrices (resize == matmul with a one-hot matrix)
    e_up = _selection_matrix(Tv, Ta)      # v (Cv,Tv) @ e_up -> (Cv,Ta)
    d_dn = _selection_matrix(Ta, Tv)      # a (Ca,Ta) @ d_dn -> (Ca,Tv)

    # Split each Conv1d(k=1) weight over the two concatenated inputs.
    waa = params["w_wav"][:, :Ca].astype(jnp.bfloat16)   # (Ca, Ca)
    wav = params["w_wav"][:, Ca:].astype(jnp.bfloat16)   # (Ca, Cv)
    wva = params["w_vid"][:, :Ca].astype(jnp.bfloat16)   # (Cv, Ca)
    wvv = params["w_vid"][:, Ca:].astype(jnp.bfloat16)   # (Cv, Cv)
    ba = params["b_wav"].reshape(Ca, 1).astype(jnp.float32)
    ga = params["g_wav"].reshape(Ca, 1).astype(jnp.float32)
    bta = params["beta_wav"].reshape(Ca, 1).astype(jnp.float32)
    bv = params["b_vid"].reshape(Cv, 1).astype(jnp.float32)
    gv = params["g_vid"].reshape(Cv, 1).astype(jnp.float32)
    btv = params["beta_vid"].reshape(Cv, 1).astype(jnp.float32)

    batch3 = lambda b: (b, 0, 0)
    const2 = lambda b: (0, 0)

    in_bytes = jnp.dtype(a.dtype).itemsize
    out_bytes = jnp.dtype(out_dtype).itemsize

    a_out, v_out = pl.pallas_call(
        _fusion_kernel,
        out_shape=(jax.ShapeDtypeStruct((B, Ca, Ta), out_dtype),
                   jax.ShapeDtypeStruct((B, Cv, Tv), out_dtype)),
        grid_spec=pltpu.PrefetchScalarGridSpec(
            num_scalar_prefetch=0,
            grid=(B,),
            in_specs=[
                pl.BlockSpec((1, Ca, Ta), batch3),     # a (native dtype, cast in-kernel)
                pl.BlockSpec((1, Cv, Tv), batch3),     # v
                pl.BlockSpec((Tv, Ta), const2),        # nearest up   (v -> Ta)
                pl.BlockSpec((Ta, Tv), const2),        # nearest down (a -> Tv)
                pl.BlockSpec((Ca, Ca), const2),        # W_wav[:, :Ca]
                pl.BlockSpec((Ca, Cv), const2),        # W_wav[:, Ca:]
                pl.BlockSpec((Ca, 1), const2),         # bias_wav
                pl.BlockSpec((Ca, 1), const2),         # gamma_wav
                pl.BlockSpec((Ca, 1), const2),         # beta_wav
                pl.BlockSpec((Cv, Ca), const2),        # W_vid[:, :Ca]
                pl.BlockSpec((Cv, Cv), const2),        # W_vid[:, Ca:]
                pl.BlockSpec((Cv, 1), const2),         # bias_vid
                pl.BlockSpec((Cv, 1), const2),         # gamma_vid
                pl.BlockSpec((Cv, 1), const2),         # beta_vid
            ],
            out_specs=[
                pl.BlockSpec((1, Ca, Ta), batch3),
                pl.BlockSpec((1, Cv, Tv), batch3),
            ],
        ),
        compiler_params=pltpu.CompilerParams(
            dimension_semantics=("parallel",),
            vmem_limit_bytes=_vmem_limit_bytes(Ca, Cv, Ta, Tv, in_bytes, out_bytes),
        ),
    )(a, v, e_up, d_dn, waa, wav, ba, ga, bta, wva, wvv, bv, gv, btv)
    return a_out, v_out


# ----------------------------------------------------------------------------
# Pure-JAX reference (original concat formulation, f32) + params
# ----------------------------------------------------------------------------
def _nearest_resize_last(x, out_size):
    in_size = x.shape[-1]
    idx = (jnp.arange(out_size) * in_size) // out_size
    return jnp.take(x, idx, axis=-1)


def _reference(a, v, params):
    Ta, Tv = a.shape[-1], v.shape[-1]
    sa = _nearest_resize_last(a, Tv)
    sv = _nearest_resize_last(v, Ta)
    xa = jnp.concatenate([a, sv], axis=1)
    xv = jnp.concatenate([sa, v], axis=1)

    def conv_gln(x, w, b, g, beta):
        y = jnp.einsum("oc,bct->bot", w, x) + b[None, :, None]
        mean = jnp.mean(y, axis=(1, 2), keepdims=True)
        var = jnp.mean((y - mean) ** 2, axis=(1, 2), keepdims=True)
        yn = (y - mean) / jnp.sqrt(var + EPS)
        return yn * g[None, :, None] + beta[None, :, None]

    return (conv_gln(xa, params["w_wav"], params["b_wav"],
                     params["g_wav"], params["beta_wav"]),
            conv_gln(xv, params["w_vid"], params["b_vid"],
                     params["g_vid"], params["beta_vid"]))


def init_params(key, ain_chan, vin_chan):
    in_chan = ain_chan + vin_chan
    k1, k2, k3, k4 = jax.random.split(key, 4)
    scale = 1.0 / jnp.sqrt(in_chan)
    return {
        "w_wav": jax.random.uniform(k1, (ain_chan, in_chan), jnp.float32, -scale, scale),
        "b_wav": jax.random.uniform(k2, (ain_chan,), jnp.float32, -scale, scale),
        "g_wav": jnp.ones((ain_chan,), jnp.float32),
        "beta_wav": jnp.zeros((ain_chan,), jnp.float32),
        "w_vid": jax.random.uniform(k3, (vin_chan, in_chan), jnp.float32, -scale, scale),
        "b_vid": jax.random.uniform(k4, (vin_chan,), jnp.float32, -scale, scale),
        "g_vid": jnp.ones((vin_chan,), jnp.float32),
        "beta_vid": jnp.zeros((vin_chan,), jnp.float32),
    }


if __name__ == "__main__":
    B, Ca, Cv, Ta, Tv = 2, 8, 8, 32, 16

    key = jax.random.PRNGKey(0)
    ka, kv, kp = jax.random.split(key, 3)
    a = jax.random.normal(ka, (B, Ca, Ta), jnp.float32)
    v = jax.random.normal(kv, (B, Cv, Tv), jnp.float32)
    params = init_params(kp, Ca, Cv)

    a_out, v_out = concat_fc2(a, v, params)
    a_out = jax.block_until_ready(a_out)
    v_out = jax.block_until_ready(v_out)

    assert a_out.shape == (B, Ca, Ta) and v_out.shape == (B, Cv, Tv)

    # numerical check vs pure-JAX f32 reference (bf16 MXU + bf16 output -> loose tol)
    a_ref, v_ref = _reference(a, v, params)
    np.testing.assert_allclose(np.asarray(a_out, dtype=np.float32),
                               np.asarray(a_ref), rtol=6e-2, atol=6e-2)
    np.testing.assert_allclose(np.asarray(v_out, dtype=np.float32),
                               np.asarray(v_ref), rtol=6e-2, atol=6e-2)

    print("KERNEL_OK")
</pallas_src>

<mosaic_0001>
module attributes {stable_mosaic.version = 11 : i64} {
  func.func @_fusion_kernel(%arg0: i32, %arg1: memref<1x8x32xf32, #tpu.memory_space<vmem>>, %arg2: memref<1x8x16xf32, #tpu.memory_space<vmem>>, %arg3: memref<16x32xbf16, #tpu.memory_space<vmem>>, %arg4: memref<32x16xbf16, #tpu.memory_space<vmem>>, %arg5: memref<8x8xbf16, #tpu.memory_space<vmem>>, %arg6: memref<8x8xbf16, #tpu.memory_space<vmem>>, %arg7: memref<8x1xf32, #tpu.memory_space<vmem>>, %arg8: memref<8x1xf32, #tpu.memory_space<vmem>>, %arg9: memref<8x1xf32, #tpu.memory_space<vmem>>, %arg10: memref<8x8xbf16, #tpu.memory_space<vmem>>, %arg11: memref<8x8xbf16, #tpu.memory_space<vmem>>, %arg12: memref<8x1xf32, #tpu.memory_space<vmem>>, %arg13: memref<8x1xf32, #tpu.memory_space<vmem>>, %arg14: memref<8x1xf32, #tpu.memory_space<vmem>>, %arg15: memref<1x8x32xbf16, #tpu.memory_space<vmem>>, %arg16: memref<1x8x16xbf16, #tpu.memory_space<vmem>>) attributes {dimension_semantics = [#tpu.dimension_semantics<parallel>], iteration_bounds = array<i64: 2>, scalar_prefetch = 0 : i64, scratch_operands = 0 : i64, tpu.core_type = #tpu.core_type<tc>, window_params = [{transform_indices = @transform_0, window_bounds = array<i64: 1, 8, 32>}, {transform_indices = @transform_1, window_bounds = array<i64: 1, 8, 16>}, {pipeline_mode = #tpu.pipeline_mode<synchronous>, transform_indices = @transform_2, window_bounds = array<i64: 16, 32>}, {pipeline_mode = #tpu.pipeline_mode<synchronous>, transform_indices = @transform_3, window_bounds = array<i64: 32, 16>}, {pipeline_mode = #tpu.pipeline_mode<synchronous>, transform_indices = @transform_4, window_bounds = array<i64: 8, 8>}, {pipeline_mode = #tpu.pipeline_mode<synchronous>, transform_indices = @transform_5, window_bounds = array<i64: 8, 8>}, {pipeline_mode = #tpu.pipeline_mode<synchronous>, transform_indices = @transform_6, window_bounds = array<i64: 8, 1>}, {pipeline_mode = #tpu.pipeline_mode<synchronous>, transform_indices = @transform_7, window_bounds = array<i64: 8, 1>}, {pipeline_mode = #tpu.pipeline_mode<synchronous>, transform_indices = @transform_8, window_bounds = array<i64: 8, 1>}, {pipeline_mode = #tpu.pipeline_mode<synchronous>, transform_indices = @transform_9, window_bounds = array<i64: 8, 8>}, {pipeline_mode = #tpu.pipeline_mode<synchronous>, transform_indices = @transform_10, window_bounds = array<i64: 8, 8>}, {pipeline_mode = #tpu.pipeline_mode<synchronous>, transform_indices = @transform_11, window_bounds = array<i64: 8, 1>}, {pipeline_mode = #tpu.pipeline_mode<synchronous>, transform_indices = @transform_12, window_bounds = array<i64: 8, 1>}, {pipeline_mode = #tpu.pipeline_mode<synchronous>, transform_indices = @transform_13, window_bounds = array<i64: 8, 1>}, {transform_indices = @transform_14, window_bounds = array<i64: 1, 8, 32>}, {transform_indices = @transform_15, window_bounds = array<i64: 1, 8, 16>}]} {
    %c0 = arith.constant 0 : index
    %c0_0 = arith.constant 0 : index
    %c0_1 = arith.constant 0 : index
    %0 = vector.load %arg1[%c0, %c0_0, %c0_1] : memref<1x8x32xf32, #tpu.memory_space<vmem>>, vector<1x8x32xf32>
    %1 = vector.shape_cast %0 : vector<1x8x32xf32> to vector<8x32xf32>
    %2 = arith.truncf %1 : vector<8x32xf32> to vector<8x32xbf16>
    %c0_2 = arith.constant 0 : index
    %c0_3 = arith.constant 0 : index
    %c0_4 = arith.constant 0 : index
    %3 = vector.load %arg2[%c0_2, %c0_3, %c0_4] : memref<1x8x16xf32, #tpu.memory_space<vmem>>, vector<1x8x16xf32>
    %4 = vector.shape_cast %3 : vector<1x8x16xf32> to vector<8x16xf32>
    %5 = arith.truncf %4 : vector<8x16xf32> to vector<8x16xbf16>
    %c0_5 = arith.constant 0 : index
    %c0_6 = arith.constant 0 : index
    %6 = vector.load %arg3[%c0_5, %c0_6] : memref<16x32xbf16, #tpu.memory_space<vmem>>, vector<16x32xbf16>
    %cst = arith.constant dense<0.000000e+00> : vector<8x32xf32>
    %7 = tpu.matmul %5, %6, %cst {dimension_numbers = #tpu.dot_dimension_numbers<[1], [0], [0], [1], [0, 0, 1, 1], [], []>} : vector<8x16xbf16>, vector<16x32xbf16>, vector<8x32xf32> -> vector<8x32xf32>
    %8 = arith.truncf %7 : vector<8x32xf32> to vector<8x32xbf16>
    %c0_7 = arith.constant 0 : index
    %c0_8 = arith.constant 0 : index
    %9 = vector.load %arg4[%c0_7, %c0_8] : memref<32x16xbf16, #tpu.memory_space<vmem>>, vector<32x16xbf16>
    %cst_9 = arith.constant dense<0.000000e+00> : vector<8x16xf32>
    %10 = tpu.matmul %2, %9, %cst_9 {dimension_numbers = #tpu.dot_dimension_numbers<[1], [0], [0], [1], [0, 0, 1, 1], [], []>} : vector<8x32xbf16>, vector<32x16xbf16>, vector<8x16xf32> -> vector<8x16xf32>
    %11 = arith.truncf %10 : vector<8x16xf32> to vector<8x16xbf16>
    %c0_10 = arith.constant 0 : index
    %c0_11 = arith.constant 0 : index
    %12 = vector.load %arg5[%c0_10, %c0_11] : memref<8x8xbf16, #tpu.memory_space<vmem>>, vector<8x8xbf16>
    %cst_12 = arith.constant dense<0.000000e+00> : vector<8x32xf32>
    %13 = tpu.matmul %12, %2, %cst_12 {dimension_numbers = #tpu.dot_dimension_numbers<[1], [0], [0], [1], [0, 0, 1, 1], [], []>} : vector<8x8xbf16>, vector<8x32xbf16>, vector<8x32xf32> -> vector<8x32xf32>
    %c0_13 = arith.constant 0 : index
    %c0_14 = arith.constant 0 : index
    %14 = vector.load %arg6[%c0_13, %c0_14] : memref<8x8xbf16, #tpu.memory_space<vmem>>, vector<8x8xbf16>
    %cst_15 = arith.constant dense<0.000000e+00> : vector<8x32xf32>
    %15 = tpu.matmul %14, %8, %cst_15 {dimension_numbers = #tpu.dot_dimension_numbers<[1], [0], [0], [1], [0, 0, 1, 1], [], []>} : vector<8x8xbf16>, vector<8x32xbf16>, vector<8x32xf32> -> vector<8x32xf32>
    %16 = arith.addf %13, %15 : vector<8x32xf32>
    %c0_16 = arith.constant 0 : index
    %c0_17 = arith.constant 0 : index
    %17 = vector.load %arg7[%c0_16, %c0_17] : memref<8x1xf32, #tpu.memory_space<vmem>>, vector<8x1xf32>
    %c0_18 = arith.constant 0 : index
    %c0_19 = arith.constant 0 : index
    %18 = vector.load %arg8[%c0_18, %c0_19] : memref<8x1xf32, #tpu.memory_space<vmem>>, vector<8x1xf32>
    %c0_20 = arith.constant 0 : index
    %c0_21 = arith.constant 0 : index
    %19 = vector.load %arg9[%c0_20, %c0_21] : memref<8x1xf32, #tpu.memory_space<vmem>>, vector<8x1xf32>
    %cst_22 = arith.constant dense<0.000000e+00> : vector<8xf32>
    %20 = vector.multi_reduction <add>, %16, %cst_22 [1] : vector<8x32xf32> to vector<8xf32>
    %21 = vector.shape_cast %20 : vector<8xf32> to vector<8x1xf32>
    %22 = vector.shape_cast %21 : vector<8x1xf32> to vector<1x8x1xf32>
    %cst_23 = arith.constant dense<0.000000e+00> : vector<1xf32>
    %23 = vector.multi_reduction <add>, %22, %cst_23 [1, 2] : vector<1x8x1xf32> to vector<1xf32>
    %24 = vector.shape_cast %23 : vector<1xf32> to vector<1x1x1xf32>
    %25 = vector.extract %24[0, 0, 0] : f32 from vector<1x1x1xf32>
    %26 = vector.shape_cast %17 : vector<8x1xf32> to vector<1x8x1xf32>
    %cst_24 = arith.constant dense<0.000000e+00> : vector<1xf32>
    %27 = vector.multi_reduction <add>, %26, %cst_24 [1, 2] : vector<1x8x1xf32> to vector<1xf32>
    %28 = vector.shape_cast %27 : vector<1xf32> to vector<1x1x1xf32>
    %29 = vector.extract %28[0, 0, 0] : f32 from vector<1x1x1xf32>
    %cst_25 = arith.constant 3.200000e+01 : f32
    %30 = arith.mulf %cst_25, %29 : f32
    %31 = arith.addf %25, %30 : f32
    %32 = arith.mulf %16, %16 : vector<8x32xf32>
    %33 = vector.shape_cast %32 : vector<8x32xf32> to vector<1x8x32xf32>
    %cst_26 = arith.constant dense<0.000000e+00> : vector<1xf32>
    %34 = vector.multi_reduction <add>, %33, %cst_26 [1, 2] : vector<1x8x32xf32> to vector<1xf32>
    %35 = vector.shape_cast %34 : vector<1xf32> to vector<1x1x1xf32>
    %36 = vector.extract %35[0, 0, 0] : f32 from vector<1x1x1xf32>
    %37 = arith.mulf %17, %21 : vector<8x1xf32>
    %38 = vector.shape_cast %37 : vector<8x1xf32> to vector<1x8x1xf32>
    %cst_27 = arith.constant dense<0.000000e+00> : vector<1xf32>
    %39 = vector.multi_reduction <add>, %38, %cst_27 [1, 2] : vector<1x8x1xf32> to vector<1xf32>
    %40 = vector.shape_cast %39 : vector<1xf32> to vector<1x1x1xf32>
    %41 = vector.extract %40[0, 0, 0] : f32 from vector<1x1x1xf32>
    %cst_28 = arith.constant 2.000000e+00 : f32
    %42 = arith.mulf %cst_28, %41 : f32
    %43 = arith.addf %36, %42 : f32
    %44 = arith.mulf %17, %17 : vector<8x1xf32>
    %45 = vector.shape_cast %44 : vector<8x1xf32> to vector<1x8x1xf32>
    %cst_29 = arith.constant dense<0.000000e+00> : vector<1xf32>
    %46 = vector.multi_reduction <add>, %45, %cst_29 [1, 2] : vector<1x8x1xf32> to vector<1xf32>
    %47 = vector.shape_cast %46 : vector<1xf32> to vector<1x1x1xf32>
    %48 = vector.extract %47[0, 0, 0] : f32 from vector<1x1x1xf32>
    %cst_30 = arith.constant 3.200000e+01 : f32
    %49 = arith.mulf %cst_30, %48 : f32
    %50 = arith.addf %43, %49 : f32
    %cst_31 = arith.constant 3.906250e-03 : f32
    %51 = arith.mulf %31, %cst_31 : f32
    %cst_32 = arith.constant 3.906250e-03 : f32
    %52 = arith.mulf %50, %cst_32 : f32
    %53 = arith.mulf %51, %51 : f32
    %54 = arith.subf %52, %53 : f32
    %cst_33 = arith.constant 0.000000e+00 : f32
    %55 = arith.maximumf %54, %cst_33 : f32
    %cst_34 = arith.constant 9.99999993E-9 : f32
    %56 = arith.addf %55, %cst_34 : f32
    %57 = math.rsqrt %56 : f32
    %58 = vector.broadcast %57 : f32 to vector<8x1xf32>
    %59 = arith.mulf %18, %58 : vector<8x1xf32>
    %60 = vector.broadcast %51 : f32 to vector<8x1xf32>
    %61 = arith.subf %17, %60 : vector<8x1xf32>
    %62 = arith.mulf %61, %59 : vector<8x1xf32>
    %63 = arith.addf %19, %62 : vector<8x1xf32>
    %64 = vector.broadcast %59 : vector<8x1xf32> to vector<8x32xf32>
    %65 = arith.mulf %16, %64 : vector<8x32xf32>
    %66 = vector.broadcast %63 : vector<8x1xf32> to vector<8x32xf32>
    %67 = arith.addf %65, %66 : vector<8x32xf32>
    %68 = arith.truncf %67 : vector<8x32xf32> to vector<8x32xbf16>
    %c0_35 = arith.constant 0 : index
    %c0_36 = arith.constant 0 : index
    %c0_37 = arith.constant 0 : index
    %69 = vector.load %arg15[%c0_35, %c0_36, %c0_37] : memref<1x8x32xbf16, #tpu.memory_space<vmem>>, vector<1x8x32xbf16>
    %70 = vector.shape_cast %69 : vector<1x8x32xbf16> to vector<8x32xbf16>
    %71 = vector.shape_cast %68 : vector<8x32xbf16> to vector<1x8x32xbf16>
    tpu.vector_store %arg15[%c0_35, %c0_36, %c0_37], %71 {strides = array<i32>} : memref<1x8x32xbf16, #tpu.memory_space<vmem>>, vector<1x8x32xbf16>,
    %c0_38 = arith.constant 0 : index
    %c0_39 = arith.constant 0 : index
    %72 = vector.load %arg10[%c0_38, %c0_39] : memref<8x8xbf16, #tpu.memory_space<vmem>>, vector<8x8xbf16>
    %cst_40 = arith.constant dense<0.000000e+00> : vector<8x16xf32>
    %73 = tpu.matmul %72, %11, %cst_40 {dimension_numbers = #tpu.dot_dimension_numbers<[1], [0], [0], [1], [0, 0, 1, 1], [], []>} : vector<8x8xbf16>, vector<8x16xbf16>, vector<8x16xf32> -> vector<8x16xf32>
    %c0_41 = arith.constant 0 : index
    %c0_42 = arith.constant 0 : index
    %74 = vector.load %arg11[%c0_41, %c0_42] : memref<8x8xbf16, #tpu.memory_space<vmem>>, vector<8x8xbf16>
    %cst_43 = arith.constant dense<0.000000e+00> : vector<8x16xf32>
    %75 = tpu.matmul %74, %5, %cst_43 {dimension_numbers = #tpu.dot_dimension_numbers<[1], [0], [0], [1], [0, 0, 1, 1], [], []>} : vector<8x8xbf16>, vector<8x16xbf16>, vector<8x16xf32> -> vector<8x16xf32>
    %76 = arith.addf %73, %75 : vector<8x16xf32>
    %c0_44 = arith.constant 0 : index
    %c0_45 = arith.constant 0 : index
    %77 = vector.load %arg12[%c0_44, %c0_45] : memref<8x1xf32, #tpu.memory_space<vmem>>, vector<8x1xf32>
    %c0_46 = arith.constant 0 : index
    %c0_47 = arith.constant 0 : index
    %78 = vector.load %arg13[%c0_46, %c0_47] : memref<8x1xf32, #tpu.memory_space<vmem>>, vector<8x1xf32>
    %c0_48 = arith.constant 0 : index
    %c0_49 = arith.constant 0 : index
    %79 = vector.load %arg14[%c0_48, %c0_49] : memref<8x1xf32, #tpu.memory_space<vmem>>, vector<8x1xf32>
    %cst_50 = arith.constant dense<0.000000e+00> : vector<8xf32>
    %80 = vector.multi_reduction <add>, %76, %cst_50 [1] : vector<8x16xf32> to vector<8xf32>
    %81 = vector.shape_cast %80 : vector<8xf32> to vector<8x1xf32>
    %82 = vector.shape_cast %81 : vector<8x1xf32> to vector<1x8x1xf32>
    %cst_51 = arith.constant dense<0.000000e+00> : vector<1xf32>
    %83 = vector.multi_reduction <add>, %82, %cst_51 [1, 2] : vector<1x8x1xf32> to vector<1xf32>
    %84 = vector.shape_cast %83 : vector<1xf32> to vector<1x1x1xf32>
    %85 = vector.extract %84[0, 0, 0] : f32 from vector<1x1x1xf32>
    %86 = vector.shape_cast %77 : vector<8x1xf32> to vector<1x8x1xf32>
    %cst_52 = arith.constant dense<0.000000e+00> : vector<1xf32>
    %87 = vector.multi_reduction <add>, %86, %cst_52 [1, 2] : vector<1x8x1xf32> to vector<1xf32>
    %88 = vector.shape_cast %87 : vector<1xf32> to vector<1x1x1xf32>
    %89 = vector.extract %88[0, 0, 0] : f32 from vector<1x1x1xf32>
    %cst_53 = arith.constant 1.600000e+01 : f32
    %90 = arith.mulf %cst_53, %89 : f32
    %91 = arith.addf %85, %90 : f32
    %92 = arith.mulf %76, %76 : vector<8x16xf32>
    %93 = vector.shape_cast %92 : vector<8x16xf32> to vector<1x8x16xf32>
    %cst_54 = arith.constant dense<0.000000e+00> : vector<1xf32>
    %94 = vector.multi_reduction <add>, %93, %cst_54 [1, 2] : vector<1x8x16xf32> to vector<1xf32>
    %95 = vector.shape_cast %94 : vector<1xf32> to vector<1x1x1xf32>
    %96 = vector.extract %95[0, 0, 0] : f32 from vector<1x1x1xf32>
    %97 = arith.mulf %77, %81 : vector<8x1xf32>
    %98 = vector.shape_cast %97 : vector<8x1xf32> to vector<1x8x1xf32>
    %cst_55 = arith.constant dense<0.000000e+00> : vector<1xf32>
    %99 = vector.multi_reduction <add>, %98, %cst_55 [1, 2] : vector<1x8x1xf32> to vector<1xf32>
    %100 = vector.shape_cast %99 : vector<1xf32> to vector<1x1x1xf32>
    %101 = vector.extract %100[0, 0, 0] : f32 from vector<1x1x1xf32>
    %cst_56 = arith.constant 2.000000e+00 : f32
    %102 = arith.mulf %cst_56, %101 : f32
    %103 = arith.addf %96, %102 : f32
    %104 = arith.mulf %77, %77 : vector<8x1xf32>
    %105 = vector.shape_cast %104 : vector<8x1xf32> to vector<1x8x1xf32>
    %cst_57 = arith.constant dense<0.000000e+00> : vector<1xf32>
    %106 = vector.multi_reduction <add>, %105, %cst_57 [1, 2] : vector<1x8x1xf32> to vector<1xf32>
    %107 = vector.shape_cast %106 : vector<1xf32> to vector<1x1x1xf32>
    %108 = vector.extract %107[0, 0, 0] : f32 from vector<1x1x1xf32>
    %cst_58 = arith.constant 1.600000e+01 : f32
    %109 = arith.mulf %cst_58, %108 : f32
    %110 = arith.addf %103, %109 : f32
    %cst_59 = arith.constant 7.812500e-03 : f32
    %111 = arith.mulf %91, %cst_59 : f32
    %cst_60 = arith.constant 7.812500e-03 : f32
    %112 = arith.mulf %110, %cst_60 : f32
    %113 = arith.mulf %111, %111 : f32
    %114 = arith.subf %112, %113 : f32
    %cst_61 = arith.constant 0.000000e+00 : f32
    %115 = arith.maximumf %114, %cst_61 : f32
    %cst_62 = arith.constant 9.99999993E-9 : f32
    %116 = arith.addf %115, %cst_62 : f32
    %117 = math.rsqrt %116 : f32
    %118 = vector.broadcast %117 : f32 to vector<8x1xf32>
    %119 = arith.mulf %78, %118 : vector<8x1xf32>
    %120 = vector.broadcast %111 : f32 to vector<8x1xf32>
    %121 = arith.subf %77, %120 : vector<8x1xf32>
    %122 = arith.mulf %121, %119 : vector<8x1xf32>
    %123 = arith.addf %79, %122 : vector<8x1xf32>
    %124 = vector.broadcast %119 : vector<8x1xf32> to vector<8x16xf32>
    %125 = arith.mulf %76, %124 : vector<8x16xf32>
    %126 = vector.broadcast %123 : vector<8x1xf32> to vector<8x16xf32>
    %127 = arith.addf %125, %126 : vector<8x16xf32>
    %128 = arith.truncf %127 : vector<8x16xf32> to vector<8x16xbf16>
    %c0_63 = arith.constant 0 : index
    %c0_64 = arith.constant 0 : index
    %c0_65 = arith.constant 0 : index
    %129 = vector.load %arg16[%c0_63, %c0_64, %c0_65] : memref<1x8x16xbf16, #tpu.memory_space<vmem>>, vector<1x8x16xbf16>
    %130 = vector.shape_cast %129 : vector<1x8x16xbf16> to vector<8x16xbf16>
    %131 = vector.shape_cast %128 : vector<8x16xbf16> to vector<1x8x16xbf16>
    tpu.vector_store %arg16[%c0_63, %c0_64, %c0_65], %131 {strides = array<i32>} : memref<1x8x16xbf16, #tpu.memory_space<vmem>>, vector<1x8x16xbf16>,
    return
  }
  func.func @transform_0(%arg0: i32) -> (i32, i32, i32) {
    %c0_i32 = arith.constant 0 : i32
    %c0_i32_0 = arith.constant 0 : i32
    %c0_i32_1 = arith.constant 0 : i32
    return %arg0, %c0_i32, %c0_i32_0 : i32, i32, i32
  }
  func.func @transform_1(%arg0: i32) -> (i32, i32, i32) {
    %c0_i32 = arith.constant 0 : i32
    %c0_i32_0 = arith.constant 0 : i32
    %c0_i32_1 = arith.constant 0 : i32
    return %arg0, %c0_i32, %c0_i32_0 : i32, i32, i32
  }
  func.func @transform_2(%arg0: i32) -> (i32, i32) {
    %c0_i32 = arith.constant 0 : i32
    %c0_i32_0 = arith.constant 0 : i32
    %c0_i32_1 = arith.constant 0 : i32
    return %c0_i32, %c0_i32_0 : i32, i32
  }
  func.func @transform_3(%arg0: i32) -> (i32, i32) {
    %c0_i32 = arith.constant 0 : i32
    %c0_i32_0 = arith.constant 0 : i32
    %c0_i32_1 = arith.constant 0 : i32
    return %c0_i32, %c0_i32_0 : i32, i32
  }
  func.func @transform_4(%arg0: i32) -> (i32, i32) {
    %c0_i32 = arith.constant 0 : i32
    %c0_i32_0 = arith.constant 0 : i32
    %c0_i32_1 = arith.constant 0 : i32
    return %c0_i32, %c0_i32_0 : i32, i32
  }
  func.func @transform_5(%arg0: i32) -> (i32, i32) {
    %c0_i32 = arith.constant 0 : i32
    %c0_i32_0 = arith.constant 0 : i32
    %c0_i32_1 = arith.constant 0 : i32
    return %c0_i32, %c0_i32_0 : i32, i32
  }
  func.func @transform_6(%arg0: i32) -> (i32, i32) {
    %c0_i32 = arith.constant 0 : i32
    %c0_i32_0 = arith.constant 0 : i32
    %c0_i32_1 = arith.constant 0 : i32
    return %c0_i32, %c0_i32_0 : i32, i32
  }
  func.func @transform_7(%arg0: i32) -> (i32, i32) {
    %c0_i32 = arith.constant 0 : i32
    %c0_i32_0 = arith.constant 0 : i32
    %c0_i32_1 = arith.constant 0 : i32
    return %c0_i32, %c0_i32_0 : i32, i32
  }
  func.func @transform_8(%arg0: i32) -> (i32, i32) {
    %c0_i32 = arith.constant 0 : i32
    %c0_i32_0 = arith.constant 0 : i32
    %c0_i32_1 = arith.constant 0 : i32
    return %c0_i32, %c0_i32_0 : i32, i32
  }
  func.func @transform_9(%arg0: i32) -> (i32, i32) {
    %c0_i32 = arith.constant 0 : i32
    %c0_i32_0 = arith.constant 0 : i32
    %c0_i32_1 = arith.constant 0 : i32
    return %c0_i32, %c0_i32_0 : i32, i32
  }
  func.func @transform_10(%arg0: i32) -> (i32, i32) {
    %c0_i32 = arith.constant 0 : i32
    %c0_i32_0 = arith.constant 0 : i32
    %c0_i32_1 = arith.constant 0 : i32
    return %c0_i32, %c0_i32_0 : i32, i32
  }
  func.func @transform_11(%arg0: i32) -> (i32, i32) {
    %c0_i32 = arith.constant 0 : i32
    %c0_i32_0 = arith.constant 0 : i32
    %c0_i32_1 = arith.constant 0 : i32
    return %c0_i32, %c0_i32_0 : i32, i32
  }
  func.func @transform_12(%arg0: i32) -> (i32, i32) {
    %c0_i32 = arith.constant 0 : i32
    %c0_i32_0 = arith.constant 0 : i32
    %c0_i32_1 = arith.constant 0 : i32
    return %c0_i32, %c0_i32_0 : i32, i32
  }
  func.func @transform_13(%arg0: i32) -> (i32, i32) {
    %c0_i32 = arith.constant 0 : i32
    %c0_i32_0 = arith.constant 0 : i32
    %c0_i32_1 = arith.constant 0 : i32
    return %c0_i32, %c0_i32_0 : i32, i32
  }
  func.func @transform_14(%arg0: i32) -> (i32, i32, i32) {
    %c0_i32 = arith.constant 0 : i32
    %c0_i32_0 = arith.constant 0 : i32
    %c0_i32_1 = arith.constant 0 : i32
    return %arg0, %c0_i32, %c0_i32_0 : i32, i32, i32
  }
  func.func @transform_15(%arg0: i32) -> (i32, i32, i32) {
    %c0_i32 = arith.constant 0 : i32
    %c0_i32_0 = arith.constant 0 : i32
    %c0_i32_1 = arith.constant 0 : i32
    return %arg0, %c0_i32, %c0_i32_0 : i32, i32, i32
  }
}

</mosaic_0001>

<bundles_post_ra>
// kernel: tpu_custom_call.1
= control target key start
LH: loop header
LB: loop body
LE: loop exit
PB: predicated region body
PF: predicated region fallthrough
CT: control target
= control target key end

     0   :  { %s1514_s0 = inlined_call_operand.vmem [shape: f32[2,8,32], index: 0, kind: input, shape index: {}]   ;;  %s1515_s1 = inlined_call_operand.vmem [shape: f32[2,8,16], index: 1, kind: input, shape index: {}]   ;;  %s1516_s2 = inlined_call_operand.vmem [shape: bf16[16,32], index: 2, kind: input, shape index: {}]   ;;  %s1517_s3 = inlined_call_operand.vmem [shape: bf16[32,16], index: 3, kind: input, shape index: {}]   ;;  %s1518_s4 = inlined_call_operand.vmem [shape: bf16[8,8], index: 4, kind: input, shape index: {}]   ;;  %s1519_s5 = inlined_call_operand.vmem [shape: bf16[8,8], index: 5, kind: input, shape index: {}]   ;;  %s1520_s6 = inlined_call_operand.vmem [shape: f32[8,1], index: 6, kind: input, shape index: {}]   ;;  %s1521_s7 = inlined_call_operand.vmem [shape: f32[8,1], index: 7, kind: input, shape index: {}]   ;;  %s1522_s8 = inlined_call_operand.vmem [shape: f32[8,1], index: 8, kind: input, shape index: {}]   ;;  %s1523_s9 = inlined_call_operand.vmem [shape: bf16[8,8], index: 9, kind: input, shape index: {}]   ;;  %s1524_s10 = inlined_call_operand.vmem [shape: bf16[8,8], index: 10, kind: input, shape index: {}]   ;;  %s1525_s11 = inlined_call_operand.vmem [shape: f32[8,1], index: 11, kind: input, shape index: {}]   ;;  %s1526_s12 = inlined_call_operand.vmem [shape: f32[8,1], index: 12, kind: input, shape index: {}]   ;;  %s1527_s13 = inlined_call_operand.vmem [shape: f32[8,1], index: 13, kind: input, shape index: {}]   ;;  %s1528_s14 = inlined_call_operand.hbm [shape: bf16[2,8,32], index: 14, kind: output, shape index: {0}]   ;;  %s1529_s15 = inlined_call_operand.hbm [shape: bf16[2,8,16], index: 15, kind: output, shape index: {1}]  }
   0x1   :  { %1535 = sst [smem:[#allocation13_spill]] %s1514_s0 }
   0x2   :  { %1536 = sst [smem:[#allocation14_spill]] %s1515_s1 }
   0x3   :  { %1537 = sst [smem:[#allocation15_spill]] %s1516_s2 }
   0x4   :  { %1538 = sst [smem:[#allocation16_spill]] %s1517_s3 }
   0x5   :  { %1539 = sst [smem:[#allocation17_spill]] %s1518_s4 }
   0x6   :  { %1540 = sst [smem:[#allocation18_spill]] %s1519_s5 }
   0x7   :  { %1541 = sst [smem:[#allocation19_spill]] %s1520_s6 }
   0x8   :  { %21 = vsyncpa [#allocation3], 0 }
   0x9   :  { %23 = vsyncpa [#allocation3 + $0x1], 0 }
   0xa   :  { %24 = vsyncpa [#allocation5], 0 }
   0xb   :  { %26 = vsyncpa [#allocation5 + $0x1], 0  ;;  %s1301_s18 = smov 0   ;;  %s1303_s19 = smov 0  }
   0xc   :  { %s1305_s20 = smov 0   ;;  %s1307_s21 = smov 0  }
   0xd LB: > { %1542 = sst [smem:[#allocation8_spill]] %s1205_s18  ;;  %s1322_s22 = sadd.s32 4294967295, %s1217_s21   ;;  %s1217_s21 = sphi %s1307_s21, %s1558_s21   ;;  %s1213_s20 = sphi %s1305_s20, %s1560_s20   ;;  %s1209_s19 = sphi %s1303_s19, %s1562_s19   ;;  %s1205_s18 = sphi %s1301_s18, %s1561_s18  }
   0xe   : > { %1543 = sst [smem:[#allocation9_spill]] %s1213_s20  ;;  %s1011_s23 = sadd.s32 4294967294, %s1217_s21  }
   0xf   : > { %s1326_s24 = sadd.s32 1, %s1217_s21   ;;  %s343_s25 = sadd.s32 1, %s1213_s20 }
  0x10   : > { %1544 = sst [smem:[#allocation10_spill]] %s1326_s24  ;;  %s340_s26 = ssub.s32 %s1217_s21, %s1326_s24 }
  0x11   : > { %p353_p0 = scmp.ne.s32.totalorder %s1213_s20, %s1209_s19  ;;  %p341_p1 = scmp.eq.s32.totalorder %s340_s26, 0 }
  0x12   : > { %p354_p2 = scmp.eq.s32.totalorder %s1322_s22, 1  ;;  %p359_p3 = scmp.ne.s32.totalorder %s1209_s19, %s1205_s18 }
  0x13   : > { %p360_p4 = scmp.eq.s32.totalorder %s1011_s23, 1  ;;  %p1014_p7 = scmp.ge.s32.totalorder %s1217_s21, 1 }
  0x14   : > { %s1337_s27 = scalar_select %p341_p1, %s1213_s20, %s343_s25  }
  0x15   : > { %p1339_p5 = por %p354_p2, %p353_p0  ;;  %p1343_p6 = por %p360_p4, %p359_p3 }
  0x16   : > { %1545 = sst [smem:[#allocation11_spill]] %s1337_s27  ;;  %p454_p8 = scmp.lt.s32.totalorder %s1217_s21, 3 }
  0x17   : > { %s1547_s29 = scalar_select %p1343_p6, 1, 0 }
  0x18   : > { %p455_p9 = pnand %p1014_p7, %p454_p8 }
  0x19   : > { %1548 = sst [smem:[#allocation12_spill]] %s1547_s29  ;;  %p510_p10 = scmp.lt.s32.totalorder (!%p455_p9), %s1322_s22, 1 }
  0x1a   : > { %458 = sbr.rel (%p455_p9) target bundleno = 943 (0x3af), region = 76  ;;  %s1549_s2 = sld [smem:[#allocation15_spill]] (!%p455_p9) }
  0x1b   : > { %s1550_s3 = sld [smem:[#allocation16_spill]] (!%p455_p9) }
  0x1c   : > { %s1551_s1 = sld [smem:[#allocation14_spill]] (!%p455_p9) }
  0x1d   : > { %s1552_s0 = sld [smem:[#allocation13_spill]] (!%p455_p9) }
  0x1e   : > { %s1553_s4 = sld [smem:[#allocation17_spill]] (!%p455_p9) }
  0x1f   : > { %s511_s25 = scalar_select %p510_p10, %s1322_s22, 1  ;;  %vm531_vm0 = vcmask 130048   ;;  %vm565_vm1 = vcmask 261120   ;;  %vm589_vm2 = vcmask 1043456   ;;  %vm585_vm3 = vcmask 64512   ;;  %v1418_v45 = vld [vmem:[%s1525_s11] sm:$0xff] }
  0x20   : > { %v1043_v0 = vld [vmem:[%s1549_s2] sm:$0xff]  ;;  %s1554_s6 = sld [smem:[#allocation19_spill]]  ;;  %vm630_vm4 = vcmask 7168   ;;  %v820_v48 = vmul.f32 %v1418_v45, %v1418_v45  ;;  %vm727_vm11 = vcmask 257024  }
  0x21   : > { %v1045_v1 = vld [vmem:[%s1550_s3 + $0x8] sm:$0xff]  ;;  %542 = vmatpush.bf16.msra.mxu0 %v1043_v0  ;;  %v1044_v2 = vld [vmem:[%s1550_s3] sm:$0xff]  ;;  %s1017_s20 = sshll.u32 %s511_s25, 3  ;;  %s1555_s5 = sld [smem:[#allocation18_spill]]  ;;  %v784_v46 = vsel %vm630_vm4, %v1418_v45, 0.0 }
  0x22   : > { %575 = vmatpush.bf16.msra.mxu1 %v1045_v1  ;;  %s517_s30 = scalar_lea.vmem %s1551_s1, %s1017_s20  ;;  %v730_v10 = vld [vmem:[%s1524_s10] sm:$0xf]  ;;  %v821_v49 = vsel %vm630_vm4, %v820_v48, 0.0 }
  0x23   : > { %s513_s2 = scalar_lea.vmem %s1552_s0, %s1017_s20  ;;  %v521_v3 = vld [vmem:[%s517_s30] sm:$0xff] }
  0x24   : > { %v519_v4 = vld [vmem:[%s513_s2] sm:$0xff]  ;;  %v522_v5 = vpack.c.bf16 %v521_v3, %v521_v3 }
  0x25   : > { %v520_v6 = vpack.c.bf16 %v519_v4, %v519_v4  ;;  %v583_v8 = vld [vmem:[%s1553_s4] sm:$0xf]  ;;  %s1219_s4 = smov 0.0  }
  0x26   : > { %576 = vmatpush.bf16.msra.mxu1 %v1044_v2  ;;  %1023 = vmatmul.msk.bf16.vlgmr.msra.gmra.mxu0 %vm531_vm0, %v522_v5  ;;  %v734_v9 = vsel %vm589_vm2, %v522_v5, 0  ;;  %v1380_v11 = vld [vmem:[%s1554_s6] sm:$0xff] }
  0x27   : > { %v609_v7 = vsel %vm589_vm2, %v520_v6, 0  ;;  %743 = vmatpush.bf16.msrb.mxu0 %v734_v9  ;;  %v641_v12 = vsel %vm630_vm4, %v1380_v11, 0.0  ;;  %v584_v19 = vld [vmem:[%s1555_s5] sm:$0xf]  ;;  %v677_v40 = vmul.f32 %v1380_v11, %v1380_v11 }
  0x28   : > { %618 = vmatpush.bf16.msra.mxu3 %v609_v7  ;;  %642 = vadd.xlane.f32.xlu1 %v641_v12  ;;  %v729_v24 = vld [vmem:[%s1523_s9] sm:$0xf] }
  0x29   : > { %1032 = vmatmul.msk.bf16.vlgmr.msra.gmra.mxu1 %vm565_vm1, %v520_v6  ;;  %v678_v42 = vsel %vm630_vm4, %v677_v40, 0.0 }
  0x2b   : > { %1034 = vmatmul.msk.bf16.vlgmr.msra.gmra.mxu3 %vm585_vm3, %v583_v8 }
  0x36   : > { %1035 = vmatmul.msk.bf16.vlgmr.msrb.gmra.mxu0 %vm585_vm3, %v730_v10 }
  0x9b   : > { %v643_v47 = vpop.xlane.xlu1 %642 }
  0x9c   : > { %v644_v50 = vrot.slane %v643_v47, 4 }
  0x9e   : > { %v645_v53 = vadd.f32 %v644_v50, %v643_v47 }
  0xa0   : > { %v646_v55 = vrot.slane %v645_v53, 2 }
  0xa2   : > { %v647_v60 = vadd.f32 %v646_v55, %v645_v53 }
  0xa3   : > { %v544_v13 = vpop.f32.mrf.mxu0 }
  0xa4   : > { %v548_v15 = vpack.c.bf16 %v544_v13, %v544_v13  ;;  %v648_v2 = vrot.slane %v647_v60, 1 }
  0xa6   : > { %v578_v14 = vpop.f32.mrf.mxu1  ;;  %v591_v17 = vsel %vm589_vm2, %v548_v15, 0  ;;  %v649_v12 = vadd.f32 %v648_v2, %v647_v60 }
  0xa7   : > { %v582_v16 = vpack.c.bf16 %v578_v14, %v578_v14  ;;  %600 = vmatpush.bf16.msra.mxu2 %v591_v17 }
  0xa9   : > { %v753_v18 = vsel %vm589_vm2, %v582_v16, 0 }
  0xaa   : > { %1033 = vmatmul.msk.bf16.vlgmr.msra.gmra.mxu2 %vm585_vm3, %v584_v19 }
  0xab   : > { %762 = vmatpush.bf16.msrb.mxu2 %v753_v18  ;;  %v546_v20 = vpop.f32.mrf.mxu0 }
  0xae   : > { %v580_v21 = vpop.f32.mrf.mxu1  ;;  %v620_v22 = vpop.f32.mrf.mxu3 }
  0xb3   : > { %v745_v25 = vpop.f32.mrf.mxu0 }
  0xb6   : > { %v622_v23 = vpop.f32.mrf.mxu3 }
  0xba   : > { %1036 = vmatmul.msk.bf16.vlgmr.msrb.gmra.mxu2 %vm585_vm3, %v729_v24 }
  0xbb   : > { %v747_v26 = vpop.f32.mrf.mxu0 }
 0x12d   : > { %v602_v27 = vpop.f32.mrf.mxu2 }
 0x12e   : > { %v1395_v28 = vadd.f32 %v620_v22, %v602_v27 }
 0x130   : > { %v627_v29 = vsel %vm565_vm1, %v1395_v28, 0.0  ;;  %v653_v30 = vmul.f32 %v1395_v28, %v1395_v28 }
 0x131   : > { %628 = vadd.xlane.f32.xlu0 %v627_v29 }
 0x132   : > { %v654_v31 = vsel %vm565_vm1, %v653_v30, 0.0 }
 0x133   : > { %655 = vadd.xlane.f32.xlu1 %v654_v31 }
 0x135   : > { %v604_v32 = vpop.f32.mrf.mxu2 }
 0x13d   : > { %v764_v33 = vpop.f32.mrf.mxu2 }
 0x13e   : > { %v1402_v34 = vadd.f32 %v764_v33, %v745_v25 }
 0x140   : > { %v771_v41 = vsel %vm531_vm0, %v1402_v34, 0.0  ;;  %v796_v43 = vmul.f32 %v1402_v34, %v1402_v34 }
 0x142   : > { %v797_v44 = vsel %vm531_vm0, %v796_v43, 0.0 }
 0x145   : > { %v766_v35 = vpop.f32.mrf.mxu2 }
 0x1a4   : > { %v629_v36 = vpop.xlane.xlu0 %628 }
 0x1a5   : > { %v631_v37 = vsel %vm630_vm4, %v629_v36, 0.0  ;;  %v664_v38 = vmul.f32 %v629_v36, %v1380_v11 }
 0x1a6   : > { %632 = vadd.xlane.f32.xlu0 %v631_v37  ;;  %v656_v51 = vpop.xlane.xlu1 %655 }
 0x1a7   : > { %v665_v39 = vsel %vm630_vm4, %v664_v38, 0.0  ;;  %v657_v52 = vrot.slane %v656_v51, 4 }
 0x1a8   : > { %666 = vadd.xlane.f32.xlu2 %v665_v39 }
 0x1a9   : > { %v658_v54 = vadd.f32 %v657_v52, %v656_v51 }
 0x1ab   : > { %v659_v57 = vrot.slane %v658_v54, 2 }
 0x1ad   : > { %v660_v1 = vadd.f32 %v659_v57, %v658_v54 }
 0x1ae   : > { %772 = vadd.xlane.f32.xlu0 %v771_v41 }
 0x1af   : > { %v661_v8 = vrot.slane %v660_v1, 1 }
 0x1b0   : > { %679 = vadd.xlane.f32.xlu2 %v678_v42 }
 0x1b1   : > { %v662_v18 = vadd.f32 %v661_v8, %v660_v1 }
 0x1b6   : > { %798 = vadd.xlane.f32.xlu0 %v797_v44 }
 0x1b8   : > { %785 = vadd.xlane.f32.xlu2 %v784_v46  ;;  %v1220_v46 = vmov 0  }
 0x1b9   : > { %1116 = vset.pattern.permute.xlu0 %v1220_v46  ;;  %1118 = vset.pattern.permute.xlu2 %v1220_v46 }
 0x1ba   : > { %1117 = vset.pattern.permute.xlu1 %v1220_v46 }
 0x1c0   : > { %822 = vadd.xlane.f32.xlu2 %v821_v49 }
 0x219   : > { %v633_v56 = vpop.xlane.xlu0 %632 }
 0x21a   : > { %v634_v58 = vrot.slane %v633_v56, 4 }
 0x21b   : > { %v667_v59 = vpop.xlane.xlu2 %666 }
 0x21c   : > { %v635_v61 = vadd.f32 %v634_v58, %v633_v56  ;;  %v668_v62 = vrot.slane %v667_v59, 4 }
 0x21e   : > { %v636_v63 = vrot.slane %v635_v61, 2  ;;  %v669_v0 = vadd.f32 %v668_v62, %v667_v59 }
 0x220   : > { %v670_v3 = vrot.slane %v669_v0, 2  ;;  %v637_v4 = vadd.f32 %v636_v63, %v635_v61 }
 0x221   : > { %v773_v5 = vpop.xlane.xlu0 %772 }
 0x222   : > { %v774_v6 = vsel %vm630_vm4, %v773_v5, 0.0  ;;  %v638_v7 = vrot.slane %v637_v4, 1  ;;  %v671_v9 = vadd.f32 %v670_v3, %v669_v0  ;;  %v807_v16 = vmul.f32 %v773_v5, %v1418_v45 }
 0x223   : > { %v680_v10 = vpop.xlane.xlu2 %679  ;;  %775 = vadd.xlane.f32.xlu1 %v774_v6 }
 0x224   : > { %v681_v13 = vrot.slane %v680_v10, 4  ;;  %v639_v14 = vadd.f32 %v638_v7, %v637_v4  ;;  %v672_v15 = vrot.slane %v671_v9, 1  ;;  %v808_v21 = vsel %vm630_vm4, %v807_v16, 0.0 }
 0x226   : > { %v682_v17 = vadd.f32 %v681_v13, %v680_v10  ;;  %1046 = vpush %v639_v14  ;;  %v673_v19 = vadd.f32 %v672_v15, %v671_v9  ;;  %v625_v9 = vld [vmem:[%s1521_s7] sm:$0xff] }
 0x227   : > { %1048 = vpush %v649_v12  ;;  %v626_v14 = vld [vmem:[%s1522_s8] sm:$0xff] }
 0x228   : > { %v683_v20 = vrot.slane %v682_v17, 2  ;;  %1050 = vpush %v662_v18 }
 0x229   : > { %1052 = vpush %v673_v19  ;;  %v799_v36 = vpop.xlane.xlu0 %798 }
 0x22a   : > { %v684_v22 = vadd.f32 %v683_v20, %v682_v17  ;;  %v800_v38 = vrot.slane %v799_v36, 4 }
 0x22b   : > { %809 = vadd.xlane.f32.xlu1 %v808_v21  ;;  %v786_v35 = vpop.xlane.xlu2 %785 }
 0x22c   : > { %v685_v23 = vrot.slane %v684_v22, 1  ;;  %v787_v37 = vrot.slane %v786_v35, 4  ;;  %v801_v40 = vadd.f32 %v800_v38, %v799_v36 }
 0x22e   : > { %v686_v24 = vadd.f32 %v685_v23, %v684_v22  ;;  %v788_v39 = vadd.f32 %v787_v37, %v786_v35  ;;  %v802_v47 = vrot.slane %v801_v40, 2 }
 0x230   : > { %1054 = vpush %v686_v24  ;;  %v789_v42 = vrot.slane %v788_v39, 2  ;;  %v803_v53 = vadd.f32 %v802_v47, %v801_v40 }
 0x232   : > { %v790_v51 = vadd.f32 %v789_v42, %v788_v39  ;;  %v804_v60 = vrot.slane %v803_v53, 1 }
 0x233   : > { %v823_v41 = vpop.xlane.xlu2 %822 }
 0x234   : > { %v824_v44 = vrot.slane %v823_v41, 4  ;;  %v791_v57 = vrot.slane %v790_v51, 1  ;;  %v805_v2 = vadd.f32 %v804_v60, %v803_v53 }
 0x236   : > { %v825_v50 = vadd.f32 %v824_v44, %v823_v41  ;;  %v792_v63 = vadd.f32 %v791_v57, %v790_v51 }
 0x238   : > { %v826_v55 = vrot.slane %v825_v50, 2 }
 0x23a   : > { %v827_v0 = vadd.f32 %v826_v55, %v825_v50 }
 0x23c   : > { %v828_v4 = vrot.slane %v827_v0, 1 }
 0x23e   : > { %v829_v7 = vadd.f32 %v828_v4, %v827_v0 }
 0x257   : > { %s1047_s24 = spop %1046 }
 0x258   : > { %s1049_s27 = spop %1048 }
 0x259   : > { %s651_s2 = smul.f32 32.0, %s1049_s27  ;;  %s1051_s18 = spop %1050 }
 0x25a   : > { %s1053_s20 = spop %1052 }
 0x25b   : > { %s652_s29 = sadd.f32 %s1047_s24, %s651_s2  ;;  %s675_s17 = smul.f32 2.0, %s1053_s20 }
 0x25d   : > { %s1428_s23 = smul.f32 0.00390625, %s652_s29  ;;  %s676_s26 = sadd.f32 %s1051_s18, %s675_s17 }
 0x25f   : > { %s692_s0 = smul.f32 %s1428_s23, %s1428_s23  ;;  %v710_v8 = vstv %s1428_s23 }
 0x260   : > { %v711_v13 = vsub.f32 %v1380_v11, %v710_v8 }
 0x261   : > { %s1055_s25 = spop %1054 }
 0x262   : > { %s688_s30 = smul.f32 32.0, %s1055_s25 }
 0x264   : > { %s689_s16 = sadd.f32 %s688_s30, %s676_s26 }
 0x266   : > { %s691_s1 = smul.f32 0.00390625, %s689_s16 }
 0x268   : > { %s693_s3 = ssub.f32 %s691_s1, %s692_s0 }
 0x26a   : > { %s694_s5 = smax.f32 %s1219_s4, %s693_s3 }
 0x26b   : > { %s695_s6 = sadd.f32 1e-08, %s694_s5 }
 0x26d   : > { %v696_v25 = vstv %s695_s6 }
 0x26e   : > { %1119 = vrsqrt.f32 %v696_v25  ;;  %vm703_vm6 = vweird.f32 %v696_v25 }
 0x274   : > { %v1120_v26 = vpop.eup %1119 }
 0x275   : > { %v698_v27 = vmul.f32 %v1120_v26, %v696_v25  ;;  %vm704_vm5 = vweird.f32 %v1120_v26 }
 0x276   : > { %vm705_vm7 = vmor %vm703_vm6, %vm704_vm5 }
 0x277   : > { %v699_v29 = vmul.f32 %v1120_v26, %v698_v27 }
 0x279   : > { %v700_v30 = vmul.f32 0.5, %v699_v29 }
 0x27b   : > { %v701_v31 = vsub.f32 1.5, %v700_v30 }
 0x27d   : > { %v702_v32 = vmul.f32 %v1120_v26, %v701_v31 }
 0x27f   : > { %v706_v33 = vsel %vm705_vm7, %v1120_v26, %v702_v32 }
 0x280   : > { %1056 = vpush %v706_v33 }
 0x296   : > { %v776_v43 = vpop.xlane.xlu1 %775 }
 0x297   : > { %v777_v48 = vrot.slane %v776_v43, 4 }
 0x299   : > { %v778_v49 = vadd.f32 %v777_v48, %v776_v43 }
 0x29b   : > { %v779_v52 = vrot.slane %v778_v49, 2 }
 0x29d   : > { %v780_v54 = vadd.f32 %v779_v52, %v778_v49 }
 0x29e   : > { %v810_v56 = vpop.xlane.xlu1 %809 }
 0x29f   : > { %v811_v58 = vrot.slane %v810_v56, 4  ;;  %v781_v59 = vrot.slane %v780_v54, 1 }
 0x2a1   : > { %v812_v61 = vadd.f32 %v811_v58, %v810_v56  ;;  %v782_v62 = vadd.f32 %v781_v59, %v780_v54 }
 0x2a3   : > { %v813_v1 = vrot.slane %v812_v61, 2  ;;  %1058 = vpush %v782_v62 }
 0x2a4   : > { %1060 = vpush %v792_v63 }
 0x2a5   : > { %1062 = vpush %v805_v2  ;;  %v814_v3 = vadd.f32 %v813_v1, %v812_v61 }
 0x2a7   : > { %v815_v5 = vrot.slane %v814_v3, 1 }
 0x2a9   : > { %v816_v6 = vadd.f32 %v815_v5, %v814_v3 }
 0x2ab   : > { %1064 = vpush %v816_v6 }
 0x2ac   : > { %1066 = vpush %v829_v7 }
 0x2b1   : > { %s1057_s3 = spop %1056 }
 0x2b2   : > { %v708_v10 = vstv %s1057_s3 }
 0x2b3   : > { %v709_v12 = vmul.f32 %v708_v10, %v625_v9 }
 0x2b5   : > { %v712_v15 = vmul.f32 %v711_v13, %v709_v12  ;;  %716 = vperm.xlu0 %1116, %v709_v12  }
 0x2b7   : > { %v713_v16 = vadd.f32 %v712_v15, %v626_v14 }
 0x2b9   : > { %722 = vperm.xlu2 %1118, %v713_v16  }
 0x2d4   : > { %s1059_s24 = spop %1058 }
 0x2d5   : > { %s1061_s27 = spop %1060 }
 0x2d6   : > { %s794_s2 = smul.f32 16.0, %s1061_s27  ;;  %s1063_s20 = spop %1062 }
 0x2d7   : > { %s1039_s27 = sshll.u32 %s1322_s22, 2 }
 0x2d8   : > { %s795_s18 = sadd.f32 %s1059_s24, %s794_s2  ;;  %s1447_s24 = sand.u32 1, %s1209_s19  }
 0x2d9   : > { %s1143_s2 = scalar_lea.hbm %s1528_s14, 8 }
 0x2da   : > { %s1441_s25 = smul.f32 0.0078125, %s795_s18 }
 0x2dc   : > { %s1065_s29 = spop %1064  ;;  %s835_s0 = smul.f32 %s1441_s25, %s1441_s25  ;;  %v853_v30 = vstv %s1441_s25 }
 0x2dd   : > { %s818_s17 = smul.f32 2.0, %s1065_s29  ;;  %s1067_s23 = spop %1066 }
 0x2de   : > { %s831_s30 = smul.f32 16.0, %s1067_s23 }
 0x2df   : > { %s819_s26 = sadd.f32 %s1063_s20, %s818_s17  ;;  %s888_s20 = scalar_lea.hbm %s1528_s14, %s1039_s27 }
 0x2e0   : > { %s892_s23 = sshll.u32 %s888_s20, 4  ;;  %s893_s23 = int_to_ptr.hbm [resolvable:$true] %s892_s23 }
 0x2e1   : > { %s832_s16 = sadd.f32 %s831_s30, %s819_s26 }
 0x2e3   : > { %s834_s1 = smul.f32 0.0078125, %s832_s16 }
 0x2e5   : > { %s836_s3 = ssub.f32 %s834_s1, %s835_s0  ;;  %s873_s0 = scalar_lea.sflag [#allocation3], %s1447_s24 }
 0x2e6   : > { %s1137_s1 = sshra.s32 %s893_s23, 4  ;;  %s1138_s1 = int_to_ptr.hbm [resolvable:$true] %s1137_s1 }
 0x2e7   : > { %s837_s5 = smax.f32 %s1219_s4, %s836_s3  ;;  %s1015_s4 = sshll.u32 %s1447_s24, 2 }
 0x2e8   : > { %s838_s6 = sadd.f32 1e-08, %s837_s5  ;;  %s502_s29 = scalar_lea.vmem [#allocation2], %s1015_s4 }
 0x2e9   : > { %s890_s17 = sshll.u32 %s502_s29, 4  ;;  %s1139_s3 = scalar_lea.hbm %s1138_s1, 4  ;;  %s891_s17 = int_to_ptr.vmem [resolvable:$true] %s890_s17 }
 0x2ea   : > { %v839_v11 = vstv %s838_s6  ;;  %p1140_p11 = scmp.ne.s32.totalorder %s1138_s1, %s1139_s3  ;;  %p1144_p0 = scmp.lt.s32.totalorder %s1138_s1, %s1528_s14 }
 0x2eb   : > { %1121 = vrsqrt.f32 %v839_v11  ;;  %vm846_vm9 = vweird.f32 %v839_v11  ;;  %p1145_p1 = scmp.lt.s32.totalorder %s1143_s2, %s1139_s3 }
 0x2ec   : > { %p1141_p12 = pnand %p1140_p11, %p1339_p5 }
 0x2ed   : > { %p1146_p2 = por %p1145_p1, %p1144_p0 }
 0x2ee   : > { %p1142_p13 = pneg %p1141_p12 }
 0x2f0   : > { %p1147_p3 = pnand %p1146_p2, %p1142_p13 }
 0x2f1   : > { %v1122_v17 = vpop.eup %1121 }
 0x2f2   : > { %v841_v18 = vmul.f32 %v1122_v17, %v839_v11  ;;  %vm847_vm8 = vweird.f32 %v1122_v17 }
 0x2f3   : > { %vm848_vm10 = vmor %vm846_vm9, %vm847_vm8 }
 0x2f4   : > { %v842_v19 = vmul.f32 %v1122_v17, %v841_v18 }
 0x2f6   : > { %v843_v20 = vmul.f32 0.5, %v842_v19 }
 0x2f8   : > { %v844_v21 = vsub.f32 1.5, %v843_v20 }
 0x2fa   : > { %v845_v22 = vmul.f32 %v1122_v17, %v844_v21 }
 0x2fc   : > { %v849_v23 = vsel %vm848_vm10, %v1122_v17, %v845_v22 }
 0x2fd   : > { %1068 = vpush %v849_v23 }
 0x313   : > { %v723_v26 = vpop.permute.xlu2 %722 }
 0x327   : > { %v717_v24 = vpop.permute.xlu0 %716 }
 0x328   : > { %v719_v25 = vmul.f32 %v717_v24, %v1395_v28  ;;  %v769_v28 = vld [vmem:[%s1526_s12] sm:$0xff] }
 0x32a   : > { %v725_v27 = vadd.f32 %v723_v26, %v719_v25 }
 0x32c   : > { %v726_v29 = vpack.c.bf16 %v725_v27, %v725_v27 }
 0x32e   : > { %s1069_s16 = spop %1068  ;;  %728 = vst.msk [vmem:[%s502_s29] sm:$0xf] %vm727_vm11, %v726_v29 }
 0x32f   : > { %v851_v31 = vstv %s1069_s16 }
 0x330   : > { %1150 = shalt.err (!%p1147_p3)
}
 0x331   : > { %1070 = dma.vmem_to_hbm [thread:$0]  (%p1339_p5), %s891_s17, 64, %s893_s23, %s873_s0   ;;  %v852_v32 = vmul.f32 %v851_v31, %v769_v28  ;;  %v854_v33 = vsub.f32 %v1418_v45, %v853_v30  ;;  %v770_v35 = vld [vmem:[%s1527_s13] sm:$0xff]  ;;  %vm870_vm12 = vcmask 125952  }
 0x332   : > { %s902_s16 = scalar_lea.hbm %s1529_s15, %s1039_s27  ;;  %s509_s17 = scalar_lea.vmem [#allocation4], %s1015_s4 }
 0x333   : > { %v855_v36 = vmul.f32 %v854_v33, %v852_v32  ;;  %859 = vperm.xlu1 %1117, %v852_v32   ;;  %s904_s23 = sshll.u32 %s509_s17, 4  ;;  %s906_s0 = sshll.u32 %s902_s16, 4  ;;  %s905_s23 = int_to_ptr.vmem [resolvable:$true] %s904_s23  ;;  %s907_s0 = int_to_ptr.hbm [resolvable:$true] %s906_s0 }
 0x334   : > { %s878_s22 = scalar_lea.sflag [#allocation5], %s1447_s24  ;;  %s1165_s1 = sshra.s32 %s907_s0, 4  ;;  %s1166_s1 = int_to_ptr.hbm [resolvable:$true] %s1165_s1 }
 0x335   : > { %v856_v37 = vadd.f32 %v855_v36, %v770_v35  ;;  %s1167_s3 = scalar_lea.hbm %s1166_s1, 4  ;;  %s1171_s4 = scalar_lea.hbm %s1529_s15, 8 }
 0x336   : > { %p1168_p4 = scmp.ne.s32.totalorder %s1166_s1, %s1167_s3  ;;  %p1172_p9 = scmp.lt.s32.totalorder %s1166_s1, %s1529_s15 }
 0x337   : > { %865 = vperm.xlu2 %1118, %v856_v37   ;;  %p1173_p10 = scmp.lt.s32.totalorder %s1171_s4, %s1167_s3 }
 0x338   : > { %p1169_p7 = pnand %p1168_p4, %p1339_p5 }
 0x339   : > { %p1174_p11 = por %p1173_p10, %p1172_p9 }
 0x33a   : > { %p1170_p8 = pneg %p1169_p7 }
 0x33c   : > { %p1175_p12 = pnand %p1174_p11, %p1170_p8 }
 0x391   : > { %v866_v40 = vpop.permute.xlu2 %865 }
 0x3a5   : > { %v860_v38 = vpop.permute.xlu1 %859 }
 0x3a6   : > { %v862_v39 = vmul.f32 %v860_v38, %v1402_v34 }
 0x3a8   : > { %v868_v45 = vadd.f32 %v866_v40, %v862_v39 }
 0x3aa   : > { %v869_v41 = vpack.c.bf16 %v868_v45, %v868_v45 }
 0x3ac   : > { %871 = vst.msk [vmem:[%s509_s17] sm:$0xf] %vm870_vm12, %v869_v41 }
 0x3ad   : > { %1178 = shalt.err (!%p1175_p12)
}
 0x3ae   : > { %1071 = dma.vmem_to_hbm [thread:$0]  (%p1339_p5), %s905_s23, 64, %s907_s0, %s878_s22  }
 0x3af PF: > { %s1556_s24 = sld [smem:[#allocation8_spill]]  ;;  %p1081_p13 = scmp.ge.s32.totalorder %s1217_s21, 2 }
 0x3b1   : > { %p1075_p0 = pnand %p1081_p13, %p1343_p6 }
 0x3b3   : > { %p1076_p1 = pneg %p1075_p0 }
 0x3b5   : > { %s918_s18 = sand.u32 1, %s1556_s24  }
 0x3b6   : > { %s919_s20 = scalar_lea.sflag [#allocation3], %s918_s18 }
 0x3b7   : > { %1196 = dma.done.wait (%p1076_p1), %s919_s20, 64  }
 0x3b8   : > { %1198 = vsyncadd (%p1076_p1), %s919_s20, 4294967232  ;;  %s929_s29 = scalar_lea.sflag [#allocation5], %s918_s18 }
 0x3b9   : > { %1200 = dma.done.wait (%p1076_p1), %s929_s29, 64  }
 0x3ba   : > { %1202 = vsyncadd (%p1076_p1), %s929_s29, 4294967232  ;;  %s1558_s21 = sld [smem:[#allocation10_spill]]  ;;  %s1561_s18 = smov %s1209_s19 }
 0x3bb   : > { %s1559_s26 = sld [smem:[#allocation9_spill]] }
 0x3bc   : > { %s1560_s20 = sld [smem:[#allocation11_spill]] }
 0x3c0   : > { %p29_p5 = scmp.ge.s32.totalorder %s1558_s21, 4  }
 0x3c1   : > { %s1562_s19 = smov %s1559_s26 }
 0x3c2   :  { %31 = sbr.rel (!%p29_p5) target bundleno = 13 (0xd), region = 131 }
 0x3c7   :  { %935 = vsyncpa [#allocation3], 1 }
 0x3c8   :  { %937 = vsyncpa [#allocation3 + $0x1], 1 }
 0x3c9   :  { %938 = vsyncpa [#allocation5], 1 }
 0x3ca   :  { %940 = vsyncpa [#allocation5 + $0x1], 1 }

</bundles_post_ra>
